<compile_context>
chip_gen: v7x
topology: tpu7x:2x2x1
jax: 0.10.0
libtpu: 0.0.40
codegen_flags: <defaults>
</compile_context>

<pallas_src>
import functools

import jax
import jax.numpy as jnp
from jax import lax
from jax.experimental import pallas as pl
from jax.experimental.pallas import tpu as pltpu

C_IN, C_MID, C_OUT = 32, 16, 3   # channel sizes fixed by the nn.Sequential
K1, K2 = 3, 2                    # conv kernel sizes
SEG_O = 128                      # lanes per output-parity segment (needs >= W*(W+2))
SEG_H = 256                      # lanes per conv1 (hidden) plane per batch


def make_params(key):
    """Deterministic synthetic parameters in PyTorch Conv2d (Cout,Cin,kh,kw) layout."""
    k1, k2, k3, k4 = jax.random.split(key, 4)
    w1 = jax.random.normal(k1, (C_MID, C_IN, K1, K1), jnp.float32) * 0.05
    b1 = jax.random.normal(k2, (C_MID,), jnp.float32) * 0.05
    w2 = jax.random.normal(k3, (C_OUT, C_MID, K2, K2), jnp.float32) * 0.1
    b2 = jax.random.normal(k4, (C_OUT,), jnp.float32) * 0.1
    return w1, b1, w2, b2


def pack_params(w1, b1, w2, b2):
    """One-time repack of the torch weights into the fused-matmul layouts (hoisted
    out of the per-call path per the perf review)."""
    t1 = lambda dy, dx: w1[:, :, dy, dx]                       # (16, 32)
    z = jnp.zeros((C_MID, C_IN), jnp.float32)
    # Fused conv1 weight: rows = 4 output parities x 16 channels; cols = 4 input slabs
    # (x00|x01|x10|x11) x 32 channels.  Unused tap slots are zero -- the extra zero MACs
    # ride on the single K=128 MXU push that already exists.
    w1f = jnp.concatenate([
        jnp.concatenate([t1(0, 0), t1(0, 2), t1(2, 0), t1(2, 2)], 1),  # h00 (even,even)
        jnp.concatenate([z,        t1(0, 1), z,        t1(2, 1)], 1),  # h01 (even,odd)
        jnp.concatenate([z,        z,        t1(1, 0), t1(1, 2)], 1),  # h10 (odd,even)
        jnp.concatenate([z,        z,        z,        t1(1, 1)], 1),  # h11 (odd,odd)
    ], 0)                                                      # (64, 128)
    b1f = jnp.tile(b1, 4).reshape(4 * C_MID, 1)                # (64, 1)
    t2 = lambda dy, dx: w2[:, :, dy, dx]
    w2f = jnp.concatenate([t2(0, 0), t2(0, 1), t2(1, 0), t2(1, 1)], 1)  # (3, 64)
    b2f = b2.reshape(C_OUT, 1)
    return w1f, b1f, w2f, b2f


def _decoder_kernel(x_ref, w1_ref, b1_ref, w2_ref, b2_ref, o_ref, *, Bt, Nx, P):
    """One grid step: Bt batches folded onto the lane axis."""
    xv = x_ref[0]                          # (32, Bt*Nx) zero-padded flat grids on lanes
    w1f = w1_ref[...]                      # (64, 128)
    b1f = b1_ref[...]                      # (64, 1)
    w2f = w2_ref[...]                      # (3, 64)
    b2f = b2_ref[...]                      # (3, 1)
    mm = lambda a, b: jnp.dot(a, b, preferred_element_type=jnp.float32)

    # ---- conv1: ONE fused matmul over all 4 output parities and all Bt batches ------
    def slab(s):                           # flat grid shifted by s; full 128-aligned width
        return jnp.concatenate(
            [xv[:, t * Nx + s: t * Nx + s + SEG_H] for t in range(Bt)], axis=1)
    x1 = jnp.concatenate([slab(0), slab(1), slab(P), slab(P + 1)], axis=0)  # (128, Bt*256)
    h = jnp.maximum(mm(w1f, x1) + b1f, 0.0)                                 # (64, Bt*256)

    # ---- conv2: ONE fused matmul; lanes = (batch, output parity) 128-lane segments ---
    def sl(p, d, t):                       # (16, 128) window of hidden parity plane p
        c0 = t * SEG_H + d
        return h[16 * p:16 * (p + 1), c0:c0 + SEG_O]
    segs = []
    for t in range(Bt):
        segs += [
            h[:, t * SEG_H: t * SEG_H + SEG_O],                                           # o00
            jnp.concatenate([sl(1, 0, t), sl(0, 1, t), sl(3, 0, t), sl(2, 1, t)], 0),     # o01
            jnp.concatenate([sl(2, 0, t), sl(3, 0, t), sl(0, P, t), sl(1, P, t)], 0),     # o10
            jnp.concatenate([sl(3, 0, t), sl(2, 1, t), sl(1, P, t), sl(0, P + 1, t)], 0), # o11
        ]
    x2 = jnp.concatenate(segs, axis=1)                                      # (64, Bt*512)
    # Single lane-dense store: 3 rows x Bt*512 lanes (multiple of 128 -> unmasked vst).
    o_ref[0] = jnp.tanh(mm(w2f, x2) + b2f)


@functools.partial(jax.jit, static_argnames=("batch_per_step",))
def decoder_forward(x, w1f, b1f, w2f, b2f, batch_per_step=2):
    """x: NCHW (B, 32, W, W) -> NCHW (B, 3, 2W, 2W).  Params from pack_params()."""
    B, C, W, Hgt = x.shape
    assert C == C_IN and W == Hgt
    P = W + 2                              # row pitch of the 1-padded compact input grid
    NO = W * P                             # valid lanes of each output parity plane
    nflat = (W + 2) * P                    # valid lanes of the padded input grid
    smax = P + 1                           # largest slab shift
    assert NO <= SEG_O and smax + SEG_O <= SEG_H, "W too large for single-block design"
    Nx = -(-max(nflat, smax + SEG_H) // 128) * 128        # per-batch lane pitch (aligned)

    Bt = batch_per_step if B % batch_per_step == 0 else 1
    G = B // Bt

    # Compact zero-padded input (implements both the interleave zeros and the conv pad),
    # spatial flattened onto lanes, Bt batches folded onto the lane axis.
    xp = jnp.pad(x, ((0, 0), (0, 0), (1, 1), (1, 1))).reshape(B, C_IN, nflat)
    xp = jnp.pad(xp, ((0, 0), (0, 0), (0, Nx - nflat)))
    xg = xp.reshape(G, Bt, C_IN, Nx).transpose(0, 2, 1, 3).reshape(G, C_IN, Bt * Nx)

    kernel = functools.partial(_decoder_kernel, Bt=Bt, Nx=Nx, P=P)
    out = pl.pallas_call(
        kernel,
        out_shape=jax.ShapeDtypeStruct((G, C_OUT, Bt * 4 * SEG_O), jnp.float32),
        grid=(G,),
        in_specs=[
            pl.BlockSpec((1, C_IN, Bt * Nx), lambda g: (g, 0, 0)),
            pl.BlockSpec((4 * C_MID, 4 * C_IN), lambda g: (0, 0)),
            pl.BlockSpec((4 * C_MID, 1), lambda g: (0, 0)),
            pl.BlockSpec((C_OUT, K2 * K2 * C_MID), lambda g: (0, 0)),
            pl.BlockSpec((C_OUT, 1), lambda g: (0, 0)),
        ],
        out_specs=pl.BlockSpec((1, C_OUT, Bt * 4 * SEG_O), lambda g: (g, 0, 0)),
        compiler_params=pltpu.CompilerParams(
            # Batch groups are independent -> eligible to shard across TensorCores (v7x).
            dimension_semantics=("parallel",),
        ),
    )(xg, w1f, b1f, w2f, b2f)

    # Unpack (G, 3, Bt*4*SEG_O) lane segments -> NCHW (B, 3, 2W, 2W); tiny, wrapper-side.
    o = out.reshape(G, C_OUT, Bt, 2, 2, SEG_O)[..., :NO]      # (G,c,t,pe,qe,NO)
    o = o.reshape(G, C_OUT, Bt, 2, 2, W, P)[..., :W]          # (G,c,t,pe,qe,y,x)
    o = jnp.transpose(o, (0, 2, 1, 5, 3, 6, 4))               # (G,t,c,y,pe,x,qe)
    return o.reshape(B, C_OUT, 2 * W, 2 * W)


def decoder_reference(x, w1, b1, w2, b2):
    """Pure-JAX reference matching the PyTorch forward exactly."""
    B, C, W, H = x.shape
    L = 2 * W + 1
    u = jnp.zeros((B, C, L, L), jnp.float32).at[:, :, 1::2, 1::2].set(x)
    dn = ("NCHW", "OIHW", "NCHW")
    h = lax.conv_general_dilated(u, w1, (1, 1), ((1, 1), (1, 1)),
                                 dimension_numbers=dn) + b1[None, :, None, None]
    h = jnp.maximum(h, 0.0)
    o = lax.conv_general_dilated(h, w2, (1, 1), ((0, 0), (0, 0)),
                                 dimension_numbers=dn) + b2[None, :, None, None]
    return jnp.tanh(o)


if __name__ == "__main__":
    key = jax.random.PRNGKey(0)
    kp, kx = jax.random.split(key)
    w1, b1, w2, b2 = make_params(kp)
    packed = pack_params(w1, b1, w2, b2)          # one-time repack (not per-forward)
    x = jax.random.normal(kx, (4, C_IN, 8, 8), jnp.float32)   # (B, 32, W, W)

    out = jax.block_until_ready(decoder_forward(x, *packed))
    ref = decoder_reference(x, w1, b1, w2, b2)

    assert out.shape == (4, 3, 16, 16), out.shape
    err = float(jnp.max(jnp.abs(out - ref)))
    assert err < 1e-4, err
    print("KERNEL_OK")
</pallas_src>

<mosaic_0001>
module attributes {stable_mosaic.version = 11 : i64} {
  func.func @_decoder_kernel(%arg0: i32, %arg1: memref<1x32x768xf32, #tpu.memory_space<vmem>>, %arg2: memref<64x128xf32, #tpu.memory_space<vmem>>, %arg3: memref<64x1xf32, #tpu.memory_space<vmem>>, %arg4: memref<3x64xf32, #tpu.memory_space<vmem>>, %arg5: memref<3x1xf32, #tpu.memory_space<vmem>>, %arg6: memref<1x3x1024xf32, #tpu.memory_space<vmem>>) attributes {dimension_semantics = [#tpu.dimension_semantics<parallel>], iteration_bounds = array<i64: 2>, scalar_prefetch = 0 : i64, scratch_operands = 0 : i64, tpu.core_type = #tpu.core_type<tc>, window_params = [{transform_indices = @transform_0, window_bounds = array<i64: 1, 32, 768>}, {pipeline_mode = #tpu.pipeline_mode<synchronous>, transform_indices = @transform_1, window_bounds = array<i64: 64, 128>}, {pipeline_mode = #tpu.pipeline_mode<synchronous>, transform_indices = @transform_2, window_bounds = array<i64: 64, 1>}, {pipeline_mode = #tpu.pipeline_mode<synchronous>, transform_indices = @transform_3, window_bounds = array<i64: 3, 64>}, {pipeline_mode = #tpu.pipeline_mode<synchronous>, transform_indices = @transform_4, window_bounds = array<i64: 3, 1>}, {transform_indices = @transform_5, window_bounds = array<i64: 1, 3, 1024>}]} {
    %c0 = arith.constant 0 : index
    %c0_0 = arith.constant 0 : index
    %c0_1 = arith.constant 0 : index
    %0 = vector.load %arg1[%c0, %c0_0, %c0_1] : memref<1x32x768xf32, #tpu.memory_space<vmem>>, vector<1x32x768xf32>
    %1 = vector.shape_cast %0 : vector<1x32x768xf32> to vector<32x768xf32>
    %c0_2 = arith.constant 0 : index
    %c0_3 = arith.constant 0 : index
    %2 = vector.load %arg2[%c0_2, %c0_3] : memref<64x128xf32, #tpu.memory_space<vmem>>, vector<64x128xf32>
    %c0_4 = arith.constant 0 : index
    %c0_5 = arith.constant 0 : index
    %3 = vector.load %arg3[%c0_4, %c0_5] : memref<64x1xf32, #tpu.memory_space<vmem>>, vector<64x1xf32>
    %c0_6 = arith.constant 0 : index
    %c0_7 = arith.constant 0 : index
    %4 = vector.load %arg4[%c0_6, %c0_7] : memref<3x64xf32, #tpu.memory_space<vmem>>, vector<3x64xf32>
    %c0_8 = arith.constant 0 : index
    %c0_9 = arith.constant 0 : index
    %5 = vector.load %arg5[%c0_8, %c0_9] : memref<3x1xf32, #tpu.memory_space<vmem>>, vector<3x1xf32>
    %6 = vector.extract_strided_slice %1 {offsets = [0, 0], sizes = [32, 256], strides = [1, 1]} : vector<32x768xf32> to vector<32x256xf32>
    %7 = vector.extract_strided_slice %1 {offsets = [0, 384], sizes = [32, 256], strides = [1, 1]} : vector<32x768xf32> to vector<32x256xf32>
    %8 = tpu.concatenate %6, %7 in 1 : vector<32x256xf32>, vector<32x256xf32> -> vector<32x512xf32>
    %9 = vector.extract_strided_slice %1 {offsets = [0, 1], sizes = [32, 256], strides = [1, 1]} : vector<32x768xf32> to vector<32x256xf32>
    %10 = vector.extract_strided_slice %1 {offsets = [0, 385], sizes = [32, 256], strides = [1, 1]} : vector<32x768xf32> to vector<32x256xf32>
    %11 = tpu.concatenate %9, %10 in 1 : vector<32x256xf32>, vector<32x256xf32> -> vector<32x512xf32>
    %12 = vector.extract_strided_slice %1 {offsets = [0, 10], sizes = [32, 256], strides = [1, 1]} : vector<32x768xf32> to vector<32x256xf32>
    %13 = vector.extract_strided_slice %1 {offsets = [0, 394], sizes = [32, 256], strides = [1, 1]} : vector<32x768xf32> to vector<32x256xf32>
    %14 = tpu.concatenate %12, %13 in 1 : vector<32x256xf32>, vector<32x256xf32> -> vector<32x512xf32>
    %15 = vector.extract_strided_slice %1 {offsets = [0, 11], sizes = [32, 256], strides = [1, 1]} : vector<32x768xf32> to vector<32x256xf32>
    %16 = vector.extract_strided_slice %1 {offsets = [0, 395], sizes = [32, 256], strides = [1, 1]} : vector<32x768xf32> to vector<32x256xf32>
    %17 = tpu.concatenate %15, %16 in 1 : vector<32x256xf32>, vector<32x256xf32> -> vector<32x512xf32>
    %18 = tpu.concatenate %8, %11, %14, %17 in 0 : vector<32x512xf32>, vector<32x512xf32>, vector<32x512xf32>, vector<32x512xf32> -> vector<128x512xf32>
    %cst = arith.constant dense<0.000000e+00> : vector<64x512xf32>
    %19 = tpu.matmul %2, %18, %cst {dimension_numbers = #tpu.dot_dimension_numbers<[1], [0], [0], [1], [0, 0, 1, 1], [], []>} : vector<64x128xf32>, vector<128x512xf32>, vector<64x512xf32> -> vector<64x512xf32>
    %20 = vector.broadcast %3 : vector<64x1xf32> to vector<64x512xf32>
    %21 = arith.addf %19, %20 : vector<64x512xf32>
    %cst_10 = arith.constant 0.000000e+00 : f32
    %22 = vector.broadcast %cst_10 : f32 to vector<64x512xf32>
    %23 = arith.maximumf %21, %22 : vector<64x512xf32>
    %24 = vector.extract_strided_slice %23 {offsets = [0, 0], sizes = [64, 128], strides = [1, 1]} : vector<64x512xf32> to vector<64x128xf32>
    %25 = vector.extract_strided_slice %23 {offsets = [16, 0], sizes = [16, 128], strides = [1, 1]} : vector<64x512xf32> to vector<16x128xf32>
    %26 = vector.extract_strided_slice %23 {offsets = [0, 1], sizes = [16, 128], strides = [1, 1]} : vector<64x512xf32> to vector<16x128xf32>
    %27 = vector.extract_strided_slice %23 {offsets = [48, 0], sizes = [16, 128], strides = [1, 1]} : vector<64x512xf32> to vector<16x128xf32>
    %28 = vector.extract_strided_slice %23 {offsets = [32, 1], sizes = [16, 128], strides = [1, 1]} : vector<64x512xf32> to vector<16x128xf32>
    %29 = tpu.concatenate %25, %26, %27, %28 in 0 : vector<16x128xf32>, vector<16x128xf32>, vector<16x128xf32>, vector<16x128xf32> -> vector<64x128xf32>
    %30 = vector.extract_strided_slice %23 {offsets = [32, 0], sizes = [16, 128], strides = [1, 1]} : vector<64x512xf32> to vector<16x128xf32>
    %31 = vector.extract_strided_slice %23 {offsets = [48, 0], sizes = [16, 128], strides = [1, 1]} : vector<64x512xf32> to vector<16x128xf32>
    %32 = vector.extract_strided_slice %23 {offsets = [0, 10], sizes = [16, 128], strides = [1, 1]} : vector<64x512xf32> to vector<16x128xf32>
    %33 = vector.extract_strided_slice %23 {offsets = [16, 10], sizes = [16, 128], strides = [1, 1]} : vector<64x512xf32> to vector<16x128xf32>
    %34 = tpu.concatenate %30, %31, %32, %33 in 0 : vector<16x128xf32>, vector<16x128xf32>, vector<16x128xf32>, vector<16x128xf32> -> vector<64x128xf32>
    %35 = vector.extract_strided_slice %23 {offsets = [48, 0], sizes = [16, 128], strides = [1, 1]} : vector<64x512xf32> to vector<16x128xf32>
    %36 = vector.extract_strided_slice %23 {offsets = [32, 1], sizes = [16, 128], strides = [1, 1]} : vector<64x512xf32> to vector<16x128xf32>
    %37 = vector.extract_strided_slice %23 {offsets = [16, 10], sizes = [16, 128], strides = [1, 1]} : vector<64x512xf32> to vector<16x128xf32>
    %38 = vector.extract_strided_slice %23 {offsets = [0, 11], sizes = [16, 128], strides = [1, 1]} : vector<64x512xf32> to vector<16x128xf32>
    %39 = tpu.concatenate %35, %36, %37, %38 in 0 : vector<16x128xf32>, vector<16x128xf32>, vector<16x128xf32>, vector<16x128xf32> -> vector<64x128xf32>
    %40 = vector.extract_strided_slice %23 {offsets = [0, 256], sizes = [64, 128], strides = [1, 1]} : vector<64x512xf32> to vector<64x128xf32>
    %41 = vector.extract_strided_slice %23 {offsets = [16, 256], sizes = [16, 128], strides = [1, 1]} : vector<64x512xf32> to vector<16x128xf32>
    %42 = vector.extract_strided_slice %23 {offsets = [0, 257], sizes = [16, 128], strides = [1, 1]} : vector<64x512xf32> to vector<16x128xf32>
    %43 = vector.extract_strided_slice %23 {offsets = [48, 256], sizes = [16, 128], strides = [1, 1]} : vector<64x512xf32> to vector<16x128xf32>
    %44 = vector.extract_strided_slice %23 {offsets = [32, 257], sizes = [16, 128], strides = [1, 1]} : vector<64x512xf32> to vector<16x128xf32>
    %45 = tpu.concatenate %41, %42, %43, %44 in 0 : vector<16x128xf32>, vector<16x128xf32>, vector<16x128xf32>, vector<16x128xf32> -> vector<64x128xf32>
    %46 = vector.extract_strided_slice %23 {offsets = [32, 256], sizes = [16, 128], strides = [1, 1]} : vector<64x512xf32> to vector<16x128xf32>
    %47 = vector.extract_strided_slice %23 {offsets = [48, 256], sizes = [16, 128], strides = [1, 1]} : vector<64x512xf32> to vector<16x128xf32>
    %48 = vector.extract_strided_slice %23 {offsets = [0, 266], sizes = [16, 128], strides = [1, 1]} : vector<64x512xf32> to vector<16x128xf32>
    %49 = vector.extract_strided_slice %23 {offsets = [16, 266], sizes = [16, 128], strides = [1, 1]} : vector<64x512xf32> to vector<16x128xf32>
    %50 = tpu.concatenate %46, %47, %48, %49 in 0 : vector<16x128xf32>, vector<16x128xf32>, vector<16x128xf32>, vector<16x128xf32> -> vector<64x128xf32>
    %51 = vector.extract_strided_slice %23 {offsets = [48, 256], sizes = [16, 128], strides = [1, 1]} : vector<64x512xf32> to vector<16x128xf32>
    %52 = vector.extract_strided_slice %23 {offsets = [32, 257], sizes = [16, 128], strides = [1, 1]} : vector<64x512xf32> to vector<16x128xf32>
    %53 = vector.extract_strided_slice %23 {offsets = [16, 266], sizes = [16, 128], strides = [1, 1]} : vector<64x512xf32> to vector<16x128xf32>
    %54 = vector.extract_strided_slice %23 {offsets = [0, 267], sizes = [16, 128], strides = [1, 1]} : vector<64x512xf32> to vector<16x128xf32>
    %55 = tpu.concatenate %51, %52, %53, %54 in 0 : vector<16x128xf32>, vector<16x128xf32>, vector<16x128xf32>, vector<16x128xf32> -> vector<64x128xf32>
    %56 = tpu.concatenate %24, %29, %34, %39, %40, %45, %50, %55 in 1 : vector<64x128xf32>, vector<64x128xf32>, vector<64x128xf32>, vector<64x128xf32>, vector<64x128xf32>, vector<64x128xf32>, vector<64x128xf32>, vector<64x128xf32> -> vector<64x1024xf32>
    %cst_11 = arith.constant dense<0.000000e+00> : vector<3x1024xf32>
    %57 = tpu.matmul %4, %56, %cst_11 {dimension_numbers = #tpu.dot_dimension_numbers<[1], [0], [0], [1], [0, 0, 1, 1], [], []>} : vector<3x64xf32>, vector<64x1024xf32>, vector<3x1024xf32> -> vector<3x1024xf32>
    %58 = vector.broadcast %5 : vector<3x1xf32> to vector<3x1024xf32>
    %59 = arith.addf %57, %58 : vector<3x1024xf32>
    %60 = math.tanh %59 : vector<3x1024xf32>
    %c0_12 = arith.constant 0 : index
    %c0_13 = arith.constant 0 : index
    %c0_14 = arith.constant 0 : index
    %61 = vector.load %arg6[%c0_12, %c0_13, %c0_14] : memref<1x3x1024xf32, #tpu.memory_space<vmem>>, vector<1x3x1024xf32>
    %62 = vector.shape_cast %61 : vector<1x3x1024xf32> to vector<3x1024xf32>
    %63 = vector.shape_cast %60 : vector<3x1024xf32> to vector<1x3x1024xf32>
    tpu.vector_store %arg6[%c0_12, %c0_13, %c0_14], %63 {strides = array<i32>} : memref<1x3x1024xf32, #tpu.memory_space<vmem>>, vector<1x3x1024xf32>,
    return
  }
  func.func @transform_0(%arg0: i32) -> (i32, i32, i32) {
    %c0_i32 = arith.constant 0 : i32
    %c0_i32_0 = arith.constant 0 : i32
    %c0_i32_1 = arith.constant 0 : i32
    return %arg0, %c0_i32, %c0_i32_0 : i32, i32, i32
  }
  func.func @transform_1(%arg0: i32) -> (i32, i32) {
    %c0_i32 = arith.constant 0 : i32
    %c0_i32_0 = arith.constant 0 : i32
    %c0_i32_1 = arith.constant 0 : i32
    return %c0_i32, %c0_i32_0 : i32, i32
  }
  func.func @transform_2(%arg0: i32) -> (i32, i32) {
    %c0_i32 = arith.constant 0 : i32
    %c0_i32_0 = arith.constant 0 : i32
    %c0_i32_1 = arith.constant 0 : i32
    return %c0_i32, %c0_i32_0 : i32, i32
  }
  func.func @transform_3(%arg0: i32) -> (i32, i32) {
    %c0_i32 = arith.constant 0 : i32
    %c0_i32_0 = arith.constant 0 : i32
    %c0_i32_1 = arith.constant 0 : i32
    return %c0_i32, %c0_i32_0 : i32, i32
  }
  func.func @transform_4(%arg0: i32) -> (i32, i32) {
    %c0_i32 = arith.constant 0 : i32
    %c0_i32_0 = arith.constant 0 : i32
    %c0_i32_1 = arith.constant 0 : i32
    return %c0_i32, %c0_i32_0 : i32, i32
  }
  func.func @transform_5(%arg0: i32) -> (i32, i32, i32) {
    %c0_i32 = arith.constant 0 : i32
    %c0_i32_0 = arith.constant 0 : i32
    %c0_i32_1 = arith.constant 0 : i32
    return %arg0, %c0_i32, %c0_i32_0 : i32, i32, i32
  }
}

</mosaic_0001>

<bundles_post_ra>
// kernel: decoder_forward.1
= control target key start
LH: loop header
LB: loop body
LE: loop exit
PB: predicated region body
PF: predicated region fallthrough
CT: control target
= control target key end

     0   :  { %s1842_s18 = smov 0   ;;  %s2189_s0 = inlined_call_operand.vmem [shape: f32[2,32,768], index: 0, kind: input, shape index: {}]   ;;  %s2190_s1 = inlined_call_operand.vmem [shape: f32[64,128], index: 1, kind: input, shape index: {}]   ;;  %s2191_s2 = inlined_call_operand.vmem [shape: f32[64,1], index: 2, kind: input, shape index: {}]   ;;  %s2192_s3 = inlined_call_operand.vmem [shape: f32[3,64], index: 3, kind: input, shape index: {}]   ;;  %s2193_s4 = inlined_call_operand.vmem [shape: f32[3,1], index: 4, kind: input, shape index: {}]   ;;  %s2194_s5 = inlined_call_operand.vmem [shape: f32[2,3,1024], index: 5, kind: output, shape index: {}]  }
   0x1 LB: > { %s1344_s19 = sadd.s32 4294967295, %s1805_s18   ;;  %p1348_p0 = scmp.ge.s32.totalorder %s1805_s18, 1  ;;  %s1805_s18 = sphi %s1842_s18, %s15_s18  }
   0x2   : > { %p187_p1 = scmp.lt.s32.totalorder %s1805_s18, 3 }
   0x4   : > { %p188_p2 = pnand %p1348_p0, %p187_p1 }
   0x5   : > { %p215_p3 = scmp.lt.s32.totalorder (!%p188_p2), %s1344_s19, 1  ;;  %s1807_s24 = smov (!%p188_p2), 127   ;;  %v1810_v43 = vmov (!%p188_p2), 0.0   ;;  %v257_v45 = vld [vmem:[%s2191_s2] sm:$0xff] (!%p188_p2)  ;;  %v258_v46 = vld [vmem:[%s2191_s2 + $0x8] sm:$0xff] (!%p188_p2)  ;;  %v1811_v47 = vmov (!%p188_p2), 0  }
   0x6   : > { %191 = sbr.rel (%p188_p2) target bundleno = 812 (0x32c), region = 40  ;;  %s1808_s25 = smov (!%p188_p2), 118   ;;  %638 = vmatprep.mubr.f32.mxu0 (!%p188_p2), %v1810_v43  ;;  %749 = vmatprep.mubr.f32.mxu1 (!%p188_p2), %v1810_v43  ;;  %v262_v48 = vld [vmem:[%s2191_s2 + $0x28] sm:$0xff] (!%p188_p2)  ;;  %v261_v49 = vld [vmem:[%s2191_s2 + $0x20] sm:$0xff] (!%p188_p2)  ;;  %v260_v50 = vld [vmem:[%s2191_s2 + $0x18] sm:$0xff] (!%p188_p2)  ;;  %vm303_vm0 = vcmask (!%p188_p2), 1039360  }
   0x7   : > { %s1809_s26 = smov (!%p188_p2), 117   ;;  %1682 = vset.pattern.permute.xlu1 (!%p188_p2), %v1811_v47  ;;  %1681 = vset.pattern.permute.xlu0 (!%p188_p2), %v1811_v47  ;;  %v259_v51 = vld [vmem:[%s2191_s2 + $0x10] sm:$0xff] (!%p188_p2)  ;;  %v264_v52 = vld [vmem:[%s2191_s2 + $0x38] sm:$0xff] (!%p188_p2)  ;;  %vm396_vm1 = vcmask (!%p188_p2), 965632   ;;  %vm477_vm2 = vcmask (!%p188_p2), 957440   ;;  %vm973_vm3 = vcmask (!%p188_p2), 523264  }
   0x8   : > { %v263_v53 = vld [vmem:[%s2191_s2 + $0x30] sm:$0xff] (!%p188_p2) }
   0xd   : > { %s2196_s19 = smov (!%p215_p3, %s1344_s19), 1 }
   0xe   : > { %s1487_s20 = smul.u32 192, %s2196_s19 }
  0x10   : > { %s1856_s23 = scalar_lea.vmem %s2189_s0, %s1487_s20 }
  0x11   : > { %v226_v0 = vld [vmem:[%s1856_s23 + $0x8] sm:$0xff]  ;;  %v227_v1 = vld [vmem:[%s1856_s23 + $0x10] sm:$0xff]  ;;  %v225_v2 = vld [vmem:[%s1856_s23] sm:$0xff] }
  0x12   : > { %v1501_v3 = vpack.i.bf16 %v227_v1, %v226_v0  ;;  %v231_v4 = vld [vmem:[%s1856_s23 + $0x30] sm:$0xff]  ;;  %v232_v5 = vld [vmem:[%s1856_s23 + $0x38] sm:$0xff]  ;;  %v233_v6 = vld [vmem:[%s1856_s23 + $0x40] sm:$0xff] }
  0x13   : > { %v1864_v7 = vpack.i.bf16 %v231_v4, %v225_v2  ;;  %v238_v8 = vld [vmem:[%s1856_s23 + $0x68] sm:$0xff]  ;;  %v239_v9 = vld [vmem:[%s1856_s23 + $0x70] sm:$0xff]  ;;  %v1506_v10 = vpack.i.bf16 %v233_v6, %v232_v5  ;;  %v244_v12 = vld [vmem:[%s1856_s23 + $0x98] sm:$0xff]  ;;  %v1359_v20 = vpack.c.bf16 %v232_v5, %v226_v0  ;;  %v1361_v21 = vpack.c.bf16 %v231_v4, %v225_v2 }
  0x14   : > { %1502 = vrot.lane.b32.xlu0 %v1501_v3, %s1807_s24  ;;  %v1516_v11 = vpack.i.bf16 %v239_v9, %v238_v8  ;;  %v245_v13 = vld [vmem:[%s1856_s23 + $0xa0] sm:$0xff]  ;;  %v243_v15 = vld [vmem:[%s1856_s23 + $0x90] sm:$0xff]  ;;  %v1363_v22 = vpack.c.bf16 %v244_v12, %v238_v8  ;;  %v228_v24 = vld [vmem:[%s1856_s23 + $0x18] sm:$0xff] }
  0x15   : > { %1512 = vrot.lane.b32.xlu1 %v1864_v7, %s1807_s24  ;;  %v237_v14 = vld [vmem:[%s1856_s23 + $0x60] sm:$0xff]  ;;  %v1521_v16 = vpack.i.bf16 %v245_v13, %v244_v12  ;;  %v235_v19 = vld [vmem:[%s1856_s23 + $0x50] sm:$0xff]  ;;  %v234_v25 = vld [vmem:[%s1856_s23 + $0x48] sm:$0xff]  ;;  %1360 = vmatprep.subr.bf16.mxu0 %v1359_v20 }
  0x16   : > { %v1526_v17 = vpack.i.bf16 %v243_v15, %v237_v14  ;;  %v229_v18 = vld [vmem:[%s1856_s23 + $0x20] sm:$0xff]  ;;  %1362 = vmatpush1.bf16.msra.mxu0 %v1361_v21  ;;  %v1365_v26 = vpack.c.bf16 %v243_v15, %v237_v14  ;;  %v1393_v27 = vpack.c.bf16 %v234_v25, %v228_v24  ;;  %v247_v29 = vld [vmem:[%s1856_s23 + $0xb0] sm:$0xff]  ;;  %v240_v30 = vld [vmem:[%s1856_s23 + $0x78] sm:$0xff]  ;;  %v1581_v38 = vpack.i.bf16 %v234_v25, %v228_v24 }
  0x17   : > { %v1391_v23 = vpack.c.bf16 %v235_v19, %v229_v18  ;;  %1364 = vmatprep.subr.bf16.mxu0 %v1363_v22  ;;  %v241_v28 = vld [vmem:[%s1856_s23 + $0x80] sm:$0xff]  ;;  %v246_v31 = vld [vmem:[%s1856_s23 + $0xa8] sm:$0xff]  ;;  %v236_v35 = vld [vmem:[%s1856_s23 + $0x58] sm:$0xff] }
  0x18   : > { %1507 = vrot.lane.b32.xlu0 %v1506_v10, %s1807_s24  ;;  %v1395_v32 = vpack.c.bf16 %v247_v29, %v241_v28  ;;  %v1397_v33 = vpack.c.bf16 %v246_v31, %v240_v30  ;;  %v230_v34 = vld [vmem:[%s1856_s23 + $0x28] sm:$0xff]  ;;  %v1566_v37 = vpack.i.bf16 %v236_v35, %v235_v19  ;;  %v248_v40 = vld [vmem:[%s1856_s23 + $0xb8] sm:$0xff]  ;;  %v1611_v44 = vpack.i.bf16 %v246_v31, %v240_v30 }
  0x19   : > { %1517 = vrot.lane.b32.xlu1 %v1516_v11, %s1807_s24  ;;  %1392 = vmatprep.subr.bf16.mxu1 %v1391_v23  ;;  %v1561_v36 = vpack.i.bf16 %v230_v34, %v229_v18  ;;  %v242_v39 = vld [vmem:[%s1856_s23 + $0x88] sm:$0xff]  ;;  %v1596_v42 = vpack.i.bf16 %v248_v40, %v247_v29 }
  0x1a   : > { %1394 = vmatpush1.bf16.msra.mxu1 %v1393_v27  ;;  %1366 = vmatpush1.bf16.msra.mxu0 %v1365_v26  ;;  %v1591_v41 = vpack.i.bf16 %v242_v39, %v241_v28 }
  0x1b   : > { %1396 = vmatprep.subr.bf16.mxu1 %v1395_v32 }
  0x1c   : > { %1522 = vrot.lane.b32.xlu0 %v1521_v16, %s1807_s24 }
  0x1d   : > { %1527 = vrot.lane.b32.xlu1 %v1526_v17, %s1807_s24 }
  0x1e   : > { %1398 = vmatpush1.bf16.msra.mxu1 %v1397_v33 }
  0x20   : > { %1532 = vrot.lane.b32.xlu0 %v1501_v3, %s1808_s25 }
  0x21   : > { %1537 = vrot.lane.b32.xlu1 %v1506_v10, %s1808_s25 }
  0x24   : > { %1542 = vrot.lane.b32.xlu0 %v1864_v7, %s1808_s25 }
  0x25   : > { %1547 = vrot.lane.b32.xlu1 %v1516_v11, %s1808_s25 }
  0x28   : > { %1552 = vrot.lane.b32.xlu0 %v1521_v16, %s1808_s25 }
  0x29   : > { %1557 = vrot.lane.b32.xlu1 %v1526_v17, %s1808_s25 }
  0x2c   : > { %1562 = vrot.lane.b32.xlu0 %v1561_v36, %s1807_s24 }
  0x2d   : > { %1567 = vrot.lane.b32.xlu1 %v1566_v37, %s1807_s24 }
  0x30   : > { %1572 = vrot.lane.b32.xlu0 %v1501_v3, %s1809_s26 }
  0x31   : > { %1577 = vrot.lane.b32.xlu1 %v1506_v10, %s1809_s26 }
  0x34   : > { %1582 = vrot.lane.b32.xlu0 %v1581_v38, %s1807_s24 }
  0x35   : > { %1587 = vrot.lane.b32.xlu1 %v1864_v7, %s1809_s26 }
  0x38   : > { %1592 = vrot.lane.b32.xlu0 %v1591_v41, %s1807_s24 }
  0x39   : > { %1597 = vrot.lane.b32.xlu1 %v1596_v42, %s1807_s24 }
  0x3c   : > { %1602 = vrot.lane.b32.xlu0 %v1516_v11, %s1809_s26 }
  0x3d   : > { %1607 = vrot.lane.b32.xlu1 %v1521_v16, %s1809_s26 }
  0x40   : > { %1612 = vrot.lane.b32.xlu0 %v1611_v44, %s1807_s24 }
  0x41   : > { %1617 = vrot.lane.b32.xlu1 %v1526_v17, %s1809_s26 }
  0x44   : > { %1622 = vrot.lane.b32.xlu0 %v1561_v36, %s1808_s25 }
  0x45   : > { %1627 = vrot.lane.b32.xlu1 %v1566_v37, %s1808_s25 }
  0x48   : > { %1632 = vrot.lane.b32.xlu0 %v1581_v38, %s1808_s25 }
  0x49   : > { %1637 = vrot.lane.b32.xlu1 %v1591_v41, %s1808_s25 }
  0x4c   : > { %1642 = vrot.lane.b32.xlu0 %v1596_v42, %s1808_s25 }
  0x4d   : > { %1647 = vrot.lane.b32.xlu1 %v1611_v44, %s1808_s25 }
  0x50   : > { %1652 = vrot.lane.b32.xlu0 %v1561_v36, %s1809_s26 }
  0x51   : > { %1657 = vrot.lane.b32.xlu1 %v1566_v37, %s1809_s26 }
  0x54   : > { %1662 = vrot.lane.b32.xlu0 %v1581_v38, %s1809_s26 }
  0x55   : > { %1667 = vrot.lane.b32.xlu1 %v1591_v41, %s1809_s26 }
  0x58   : > { %1672 = vrot.lane.b32.xlu0 %v1596_v42, %s1809_s26 }
  0x59   : > { %1677 = vrot.lane.b32.xlu1 %v1611_v44, %s1809_s26 }
  0x5c   : > { %536 = vperm.xlu0 %1681, %v257_v45  }
  0x5d   : > { %541 = vperm.xlu1 %1682, %v258_v46  }
  0x60   : > { %561 = vperm.xlu0 %1681, %v262_v48  }
  0x61   : > { %556 = vperm.xlu1 %1682, %v261_v49  }
  0x64   : > { %551 = vperm.xlu0 %1681, %v260_v50  }
  0x65   : > { %546 = vperm.xlu1 %1682, %v259_v51  }
  0x68   : > { %571 = vperm.xlu0 %1681, %v264_v52  }
  0x69   : > { %566 = vperm.xlu1 %1682, %v263_v53  }
  0x86   : > { %v1503_v54 = vpop.permute.xlu0 %1502 }
  0x87   : > { %v1513_v55 = vpop.permute.xlu1 %1512  ;;  %v1505_v56 = vunpack.i.h.bf16 %v1503_v54  ;;  %v1504_v57 = vunpack.i.l.bf16 %v1503_v54 }
  0x88   : > { %v1514_v58 = vunpack.i.l.bf16 %v1513_v55  ;;  %v1515_v60 = vunpack.i.h.bf16 %v1513_v55 }
  0x89   : > { %v305_v0 = vsel %vm303_vm0, %v1504_v57, %v1505_v56 }
  0x8a   : > { %v1508_v59 = vpop.permute.xlu0 %1507  ;;  %v304_v1 = vsel %vm303_vm0, %v1514_v58, %v1504_v57 }
  0x8b   : > { %v1510_v61 = vunpack.i.h.bf16 %v1508_v59  ;;  %v1509_v62 = vunpack.i.l.bf16 %v1508_v59  ;;  %v1518_v63 = vpop.permute.xlu1 %1517 }
  0x8c   : > { %v1520_v2 = vunpack.i.h.bf16 %v1518_v63  ;;  %v1519_v3 = vunpack.i.l.bf16 %v1518_v63 }
  0x8d   : > { %v307_v4 = vsel %vm303_vm0, %v1509_v62, %v1510_v61  ;;  %v306_v5 = vsel %vm303_vm0, %v1515_v60, %v1509_v62 }
  0x8e   : > { %v1523_v6 = vpop.permute.xlu0 %1522  ;;  %v1367_v7 = vpack.c.bf16 %v307_v4, %v305_v0  ;;  %v1369_v8 = vpack.c.bf16 %v306_v5, %v304_v1  ;;  %v309_v14 = vsel %vm303_vm0, %v1519_v3, %v1520_v2 }
  0x8f   : > { %v1525_v9 = vunpack.i.h.bf16 %v1523_v6  ;;  %v1524_v10 = vunpack.i.l.bf16 %v1523_v6  ;;  %v1528_v11 = vpop.permute.xlu1 %1527 }
  0x90   : > { %v1530_v12 = vunpack.i.h.bf16 %v1528_v11  ;;  %v1529_v13 = vunpack.i.l.bf16 %v1528_v11  ;;  %1368 = vmatprep.subr.bf16.mxu0 %v1367_v7 }
  0x91   : > { %1370 = vmatpush1.bf16.msra.mxu0 %v1369_v8  ;;  %v311_v15 = vsel %vm303_vm0, %v1524_v10, %v1525_v9 }
  0x92   : > { %v1533_v16 = vpop.permute.xlu0 %1532  ;;  %v1371_v17 = vpack.c.bf16 %v311_v15, %v309_v14  ;;  %v308_v18 = vsel %vm303_vm0, %v1529_v13, %v1519_v3  ;;  %v310_v19 = vsel %vm303_vm0, %v1530_v12, %v1524_v10 }
  0x93   : > { %v1535_v20 = vunpack.i.h.bf16 %v1533_v16  ;;  %v1534_v21 = vunpack.i.l.bf16 %v1533_v16  ;;  %v1538_v22 = vpop.permute.xlu1 %1537  ;;  %v1373_v23 = vpack.c.bf16 %v310_v19, %v308_v18 }
  0x94   : > { %v1540_v24 = vunpack.i.h.bf16 %v1538_v22  ;;  %v1539_v25 = vunpack.i.l.bf16 %v1538_v22  ;;  %1372 = vmatprep.subr.bf16.mxu0 %v1371_v17 }
  0x95   : > { %1374 = vmatpush1.bf16.msra.mxu0 %v1373_v23  ;;  %v398_v26 = vsel %vm396_vm1, %v1534_v21, %v1535_v20 }
  0x96   : > { %v1543_v27 = vpop.permute.xlu0 %1542  ;;  %v400_v28 = vsel %vm396_vm1, %v1539_v25, %v1540_v24 }
  0x97   : > { %v1545_v29 = vunpack.i.h.bf16 %v1543_v27  ;;  %v1544_v30 = vunpack.i.l.bf16 %v1543_v27  ;;  %v1548_v31 = vpop.permute.xlu1 %1547  ;;  %v1375_v32 = vpack.c.bf16 %v400_v28, %v398_v26 }
  0x98   : > { %v1550_v33 = vunpack.i.h.bf16 %v1548_v31  ;;  %v1549_v34 = vunpack.i.l.bf16 %v1548_v31 }
  0x99   : > { %1376 = vmatprep.subr.bf16.mxu0 %v1375_v32  ;;  %v397_v35 = vsel %vm396_vm1, %v1544_v30, %v1534_v21  ;;  %v399_v36 = vsel %vm396_vm1, %v1545_v29, %v1539_v25 }
  0x9a   : > { %v1553_v37 = vpop.permute.xlu0 %1552  ;;  %v1377_v38 = vpack.c.bf16 %v399_v36, %v397_v35  ;;  %v402_v45 = vsel %vm396_vm1, %v1549_v34, %v1550_v33 }
  0x9b   : > { %v1555_v39 = vunpack.i.h.bf16 %v1553_v37  ;;  %v1554_v40 = vunpack.i.l.bf16 %v1553_v37  ;;  %v1558_v41 = vpop.permute.xlu1 %1557 }
  0x9c   : > { %v1560_v42 = vunpack.i.h.bf16 %v1558_v41  ;;  %v1559_v44 = vunpack.i.l.bf16 %v1558_v41  ;;  %1378 = vmatpush1.bf16.msra.mxu0 %v1377_v38 }
  0x9d   : > { %v404_v46 = vsel %vm396_vm1, %v1554_v40, %v1555_v39 }
  0x9e   : > { %v1563_v47 = vpop.permute.xlu0 %1562  ;;  %v1379_v48 = vpack.c.bf16 %v404_v46, %v402_v45  ;;  %v401_v49 = vsel %vm396_vm1, %v1559_v44, %v1549_v34  ;;  %v403_v50 = vsel %vm396_vm1, %v1560_v42, %v1554_v40 }
  0x9f   : > { %v1565_v51 = vunpack.i.h.bf16 %v1563_v47  ;;  %v1564_v52 = vunpack.i.l.bf16 %v1563_v47  ;;  %v1568_v53 = vpop.permute.xlu1 %1567  ;;  %v1381_v54 = vpack.c.bf16 %v403_v50, %v401_v49 }
  0xa0   : > { %v1570_v55 = vunpack.i.h.bf16 %v1568_v53  ;;  %v1569_v56 = vunpack.i.l.bf16 %v1568_v53  ;;  %1380 = vmatprep.subr.bf16.mxu0 %v1379_v48 }
  0xa1   : > { %1382 = vmatpush1.bf16.msra.mxu0 %v1381_v54  ;;  %v357_v57 = vsel %vm303_vm0, %v1564_v52, %v1565_v51  ;;  %v1984_v54 = vld [vmem:[%s2190_s1] sm:$0xff] }
  0xa2   : > { %v1573_v58 = vpop.permute.xlu0 %1572  ;;  %v359_v59 = vsel %vm303_vm0, %v1569_v56, %v1570_v55 }
  0xa3   : > { %v1575_v60 = vunpack.i.h.bf16 %v1573_v58  ;;  %v1574_v61 = vunpack.i.l.bf16 %v1573_v58  ;;  %v1578_v62 = vpop.permute.xlu1 %1577  ;;  %v1399_v63 = vpack.c.bf16 %v359_v59, %v357_v57 }
  0xa4   : > { %v1580_v0 = vunpack.i.h.bf16 %v1578_v62  ;;  %v1579_v1 = vunpack.i.l.bf16 %v1578_v62 }
  0xa5   : > { %1400 = vmatprep.subr.bf16.mxu1 %v1399_v63  ;;  %v479_v2 = vsel %vm477_vm2, %v1574_v61, %v1575_v60 }
  0xa6   : > { %v1583_v3 = vpop.permute.xlu0 %1582  ;;  %v481_v4 = vsel %vm477_vm2, %v1579_v1, %v1580_v0  ;;  %v1993_v0 = vld [vmem:[%s2190_s1 + $0x8] sm:$0xff] }
  0xa7   : > { %v1585_v5 = vunpack.i.h.bf16 %v1583_v3  ;;  %v1584_v6 = vunpack.i.l.bf16 %v1583_v3  ;;  %v1588_v7 = vpop.permute.xlu1 %1587  ;;  %v1383_v8 = vpack.c.bf16 %v481_v4, %v479_v2 }
  0xa8   : > { %v1590_v9 = vunpack.i.h.bf16 %v1588_v7  ;;  %v1589_v10 = vunpack.i.l.bf16 %v1588_v7 }
  0xa9   : > { %1384 = vmatprep.subr.bf16.mxu0 %v1383_v8  ;;  %v356_v11 = vsel %vm303_vm0, %v1584_v6, %v1564_v52  ;;  %v358_v12 = vsel %vm303_vm0, %v1585_v5, %v1569_v56 }
  0xaa   : > { %v1593_v13 = vpop.permute.xlu0 %1592  ;;  %v478_v14 = vsel %vm477_vm2, %v1589_v10, %v1574_v61  ;;  %v480_v15 = vsel %vm477_vm2, %v1590_v9, %v1579_v1  ;;  %v1401_v16 = vpack.c.bf16 %v358_v12, %v356_v11  ;;  %v2002_v10 = vld [vmem:[%s2190_s1 + $0x10] sm:$0xff] }
  0xab   : > { %v1595_v17 = vunpack.i.h.bf16 %v1593_v13  ;;  %v1594_v18 = vunpack.i.l.bf16 %v1593_v13  ;;  %v1598_v19 = vpop.permute.xlu1 %1597  ;;  %v1385_v20 = vpack.c.bf16 %v480_v15, %v478_v14 }
  0xac   : > { %v1600_v21 = vunpack.i.h.bf16 %v1598_v19  ;;  %v1599_v22 = vunpack.i.l.bf16 %v1598_v19  ;;  %1402 = vmatpush1.bf16.msra.mxu1 %v1401_v16 }
  0xad   : > { %1386 = vmatpush1.bf16.msra.mxu0 %v1385_v20  ;;  %v361_v23 = vsel %vm303_vm0, %v1594_v18, %v1595_v17 }
  0xae   : > { %v1603_v24 = vpop.permute.xlu0 %1602  ;;  %v363_v25 = vsel %vm303_vm0, %v1599_v22, %v1600_v21 }
  0xaf   : > { %v1605_v26 = vunpack.i.h.bf16 %v1603_v24  ;;  %v1604_v27 = vunpack.i.l.bf16 %v1603_v24  ;;  %v1608_v28 = vpop.permute.xlu1 %1607  ;;  %v1403_v29 = vpack.c.bf16 %v363_v25, %v361_v23  ;;  %v252_v23 = vld [vmem:[%s2190_s1 + $0x18] sm:$0xff] }
  0xb0   : > { %v1610_v30 = vunpack.i.h.bf16 %v1608_v28  ;;  %v1609_v31 = vunpack.i.l.bf16 %v1608_v28 }
  0xb1   : > { %1404 = vmatprep.subr.bf16.mxu1 %v1403_v29  ;;  %v483_v32 = vsel %vm477_vm2, %v1604_v27, %v1605_v26 }
  0xb2   : > { %v1613_v33 = vpop.permute.xlu0 %1612  ;;  %v485_v34 = vsel %vm477_vm2, %v1609_v31, %v1610_v30 }
  0xb3   : > { %v1615_v35 = vunpack.i.h.bf16 %v1613_v33  ;;  %v1614_v36 = vunpack.i.l.bf16 %v1613_v33  ;;  %v1618_v37 = vpop.permute.xlu1 %1617  ;;  %v1387_v38 = vpack.c.bf16 %v485_v34, %v483_v32  ;;  %v253_v33 = vld [vmem:[%s2190_s1 + $0x20] sm:$0xff] }
  0xb4   : > { %v1620_v39 = vunpack.i.h.bf16 %v1618_v37  ;;  %v1619_v40 = vunpack.i.l.bf16 %v1618_v37 }
  0xb5   : > { %1388 = vmatprep.subr.bf16.mxu0 %v1387_v38  ;;  %v360_v41 = vsel %vm303_vm0, %v1614_v36, %v1594_v18  ;;  %v362_v42 = vsel %vm303_vm0, %v1615_v35, %v1599_v22 }
  0xb6   : > { %v1623_v44 = vpop.permute.xlu0 %1622  ;;  %v482_v45 = vsel %vm477_vm2, %v1619_v40, %v1604_v27  ;;  %v484_v46 = vsel %vm477_vm2, %v1620_v39, %v1609_v31  ;;  %v1405_v47 = vpack.c.bf16 %v362_v42, %v360_v41 }
  0xb7   : > { %v1625_v48 = vunpack.i.h.bf16 %v1623_v44  ;;  %v1624_v49 = vunpack.i.l.bf16 %v1623_v44  ;;  %v1628_v50 = vpop.permute.xlu1 %1627  ;;  %v1389_v51 = vpack.c.bf16 %v484_v46, %v482_v45  ;;  %v254_v44 = vld [vmem:[%s2190_s1 + $0x28] sm:$0xff] }
  0xb8   : > { %v1630_v52 = vunpack.i.h.bf16 %v1628_v50  ;;  %v1629_v53 = vunpack.i.l.bf16 %v1628_v50  ;;  %1406 = vmatpush1.bf16.msra.mxu1 %v1405_v47 }
  0xb9   : > { %1390 = vmatpush1.bf16.msra.mxu0 %v1389_v51  ;;  %v438_v55 = vsel %vm396_vm1, %v1624_v49, %v1625_v48  ;;  %v255_v51 = vld [vmem:[%s2190_s1 + $0x30] sm:$0xff] }
  0xba   : > { %v1633_v56 = vpop.permute.xlu0 %1632  ;;  %v440_v57 = vsel %vm396_vm1, %v1629_v53, %v1630_v52  ;;  %v256_v52 = vld [vmem:[%s2190_s1 + $0x38] sm:$0xff] }
  0xbb   : > { %v1635_v58 = vunpack.i.h.bf16 %v1633_v56  ;;  %v1634_v59 = vunpack.i.l.bf16 %v1633_v56  ;;  %v1638_v60 = vpop.permute.xlu1 %1637  ;;  %v1407_v61 = vpack.c.bf16 %v440_v57, %v438_v55 }
  0xbc   : > { %639 = vmatmul.mubr.f32.vlgmr.msra.gmra.mrb[0].mxu0 %v1984_v54  ;;  %v1640_v62 = vunpack.i.h.bf16 %v1638_v60  ;;  %v1639_v63 = vunpack.i.l.bf16 %v1638_v60 }
  0xbd   : > { %644 = vmatprep.mubr.f32.mxu0 %v1810_v43  ;;  %1408 = vmatprep.subr.bf16.mxu1 %v1407_v61  ;;  %v437_v1 = vsel %vm396_vm1, %v1634_v59, %v1624_v49  ;;  %v439_v2 = vsel %vm396_vm1, %v1635_v58, %v1629_v53 }
  0xbe   : > { %v1643_v3 = vpop.permute.xlu0 %1642  ;;  %v1409_v4 = vpack.c.bf16 %v439_v2, %v437_v1  ;;  %v442_v11 = vsel %vm396_vm1, %v1639_v63, %v1640_v62 }
  0xbf   : > { %v1645_v5 = vunpack.i.h.bf16 %v1643_v3  ;;  %v1644_v6 = vunpack.i.l.bf16 %v1643_v3  ;;  %v1648_v7 = vpop.permute.xlu1 %1647 }
  0xc0   : > { %v1650_v8 = vunpack.i.h.bf16 %v1648_v7  ;;  %v1649_v9 = vunpack.i.l.bf16 %v1648_v7  ;;  %645 = vmatmul.mubr.f32.gmra.mrb[2].mxu0 %v1993_v0  ;;  %1410 = vmatpush1.bf16.msra.mxu1 %v1409_v4 }
  0xc1   : > { %650 = vmatprep.mubr.f32.mxu0 %v1810_v43  ;;  %v444_v12 = vsel %vm396_vm1, %v1644_v6, %v1645_v5 }
  0xc2   : > { %v1653_v13 = vpop.permute.xlu0 %1652  ;;  %v1411_v14 = vpack.c.bf16 %v444_v12, %v442_v11  ;;  %v441_v15 = vsel %vm396_vm1, %v1649_v9, %v1639_v63  ;;  %v443_v16 = vsel %vm396_vm1, %v1650_v8, %v1644_v6 }
  0xc3   : > { %v1655_v17 = vunpack.i.h.bf16 %v1653_v13  ;;  %v1654_v18 = vunpack.i.l.bf16 %v1653_v13  ;;  %v1658_v19 = vpop.permute.xlu1 %1657  ;;  %v1413_v20 = vpack.c.bf16 %v443_v16, %v441_v15 }
  0xc4   : > { %v1660_v21 = vunpack.i.h.bf16 %v1658_v19  ;;  %v1659_v22 = vunpack.i.l.bf16 %v1658_v19  ;;  %651 = vmatmul.mubr.f32.gmra.mrb[4].mxu0 %v2002_v10  ;;  %1412 = vmatprep.subr.bf16.mxu1 %v1411_v14 }
  0xc5   : > { %1414 = vmatpush1.bf16.msra.mxu1 %v1413_v20  ;;  %656 = vmatprep.mubr.f32.mxu0 %v1810_v43  ;;  %v519_v24 = vsel %vm477_vm2, %v1654_v18, %v1655_v17 }
  0xc6   : > { %v1663_v25 = vpop.permute.xlu0 %1662  ;;  %v521_v26 = vsel %vm477_vm2, %v1659_v22, %v1660_v21 }
  0xc7   : > { %v1665_v27 = vunpack.i.h.bf16 %v1663_v25  ;;  %v1664_v28 = vunpack.i.l.bf16 %v1663_v25  ;;  %v1668_v29 = vpop.permute.xlu1 %1667  ;;  %v1415_v30 = vpack.c.bf16 %v521_v26, %v519_v24 }
  0xc8   : > { %657 = vmatmul.mubr.f32.gmra.mrb[6].mxu0 %v252_v23  ;;  %v1670_v31 = vunpack.i.h.bf16 %v1668_v29  ;;  %v1669_v32 = vunpack.i.l.bf16 %v1668_v29 }
  0xc9   : > { %662 = vmatprep.mubr.f32.mxu0 %v1810_v43  ;;  %1416 = vmatprep.subr.bf16.mxu1 %v1415_v30  ;;  %v518_v34 = vsel %vm477_vm2, %v1664_v28, %v1654_v18  ;;  %v520_v35 = vsel %vm477_vm2, %v1665_v27, %v1659_v22 }
  0xca   : > { %v1673_v36 = vpop.permute.xlu0 %1672  ;;  %v1417_v37 = vpack.c.bf16 %v520_v35, %v518_v34  ;;  %v523_v45 = vsel %vm477_vm2, %v1669_v32, %v1670_v31 }
  0xcb   : > { %v1675_v38 = vunpack.i.h.bf16 %v1673_v36  ;;  %v1674_v39 = vunpack.i.l.bf16 %v1673_v36  ;;  %v1678_v40 = vpop.permute.xlu1 %1677 }
  0xcc   : > { %v1680_v41 = vunpack.i.h.bf16 %v1678_v40  ;;  %v1679_v42 = vunpack.i.l.bf16 %v1678_v40  ;;  %663 = vmatmul.mubr.f32.gmra.mrb[8].mxu0 %v253_v33  ;;  %1418 = vmatpush1.bf16.msra.mxu1 %v1417_v37 }
  0xcd   : > { %668 = vmatprep.mubr.f32.mxu0 %v1810_v43  ;;  %v525_v46 = vsel %vm477_vm2, %v1674_v39, %v1675_v38 }
  0xce   : > { %v1419_v47 = vpack.c.bf16 %v525_v46, %v523_v45  ;;  %v522_v48 = vsel %vm477_vm2, %v1679_v42, %v1669_v32  ;;  %v524_v49 = vsel %vm477_vm2, %v1680_v41, %v1674_v39 }
  0xcf   : > { %v1421_v50 = vpack.c.bf16 %v524_v49, %v522_v48 }
  0xd0   : > { %669 = vmatmul.mubr.f32.gmra.mrb[10].mxu0 %v254_v44  ;;  %1420 = vmatprep.subr.bf16.mxu1 %v1419_v47 }
  0xd1   : > { %1422 = vmatpush1.bf16.msra.mxu1 %v1421_v50  ;;  %674 = vmatprep.mubr.f32.mxu0 %v1810_v43 }
  0xd4   : > { %675 = vmatmul.mubr.f32.gmra.mrb[12].mxu0 %v255_v51  ;;  %750 = vmatmul.mubr.f32.vlgmr.msra.gmra.mrb[0].mxu1 %v1984_v54 }
  0xd5   : > { %679 = vmatprep.mubr.f32.mxu0 %v1810_v43  ;;  %755 = vmatprep.mubr.f32.mxu1 %v1810_v43 }
  0xd8   : > { %680 = vmatmul.mubr.f32.gmra.mrb[14].mxu0 %v256_v52  ;;  %756 = vmatmul.mubr.f32.gmra.mrb[2].mxu1 %v1993_v0 }
  0xd9   : > { %761 = vmatprep.mubr.f32.mxu1 %v1810_v43  ;;  %1041 = vmatprep.mubr.f32.mxu0 %v1810_v43 }
  0xdb   : > { %v2051_v54 = vpop.permute.xlu0 %536 }
  0xdc   : > { %762 = vmatmul.mubr.f32.gmra.mrb[4].mxu1 %v2002_v10  ;;  %v2049_v53 = vpop.permute.xlu1 %541 }
  0xdd   : > { %767 = vmatprep.mubr.f32.mxu1 %v1810_v43 }
  0xdf   : > { %v2057_v61 = vpop.permute.xlu0 %561 }
  0xe0   : > { %768 = vmatmul.mubr.f32.gmra.mrb[6].mxu1 %v252_v23  ;;  %v2053_v56 = vpop.permute.xlu1 %556 }
  0xe1   : > { %773 = vmatprep.mubr.f32.mxu1 %v1810_v43 }
  0xe3   : > { %v2065_v11 = vpop.permute.xlu0 %551 }
  0xe4   : > { %774 = vmatmul.mubr.f32.gmra.mrb[8].mxu1 %v253_v33  ;;  %v2060_v2 = vpop.permute.xlu1 %546 }
  0xe5   : > { %779 = vmatprep.mubr.f32.mxu1 %v1810_v43 }
  0xe7   : > { %v2089_v48 = vpop.permute.xlu0 %571 }
  0xe8   : > { %780 = vmatmul.mubr.f32.gmra.mrb[10].mxu1 %v254_v44  ;;  %v2086_v45 = vpop.permute.xlu1 %566 }
  0xe9   : > { %785 = vmatprep.mubr.f32.mxu1 %v1810_v43 }
  0xec   : > { %786 = vmatmul.mubr.f32.gmra.mrb[12].mxu1 %v255_v51 }
  0xed   : > { %790 = vmatprep.mubr.f32.mxu1 %v1810_v43 }
  0xf0   : > { %791 = vmatmul.mubr.f32.gmra.mrb[14].mxu1 %v256_v52 }
  0xf1   : > { %1112 = vmatprep.mubr.f32.mxu1 %v1810_v43 }
 0x18f   : > { %v640_v55 = vpop.f32.mrb[0].mxu0 }
 0x190   : > { %v641_v57 = vadd.f32 %v640_v55, %v2051_v54  ;;  %v642_v58 = vpop.f32.mrb[1].mxu0 }
 0x191   : > { %v643_v59 = vadd.f32 %v642_v58, %v2051_v54 }
 0x192   : > { %v796_v60 = vmax.f32 %v641_v57, 0.0 }
 0x193   : > { %v797_v62 = vmax.f32 %v643_v59, 0.0  ;;  %v646_v63 = vpop.f32.mrb[2].mxu0 }
 0x194   : > { %v647_v0 = vadd.f32 %v646_v63, %v2049_v53  ;;  %v648_v1 = vpop.f32.mrb[3].mxu0 }
 0x195   : > { %v649_v3 = vadd.f32 %v648_v1, %v2049_v53  ;;  %v1683_v4 = vpack.i.bf16 %v797_v62, %v796_v60 }
 0x196   : > { %v800_v5 = vmax.f32 %v647_v0, 0.0 }
 0x197   : > { %v801_v6 = vmax.f32 %v649_v3, 0.0  ;;  %v652_v7 = vpop.f32.mrb[4].mxu0  ;;  %1684 = vrot.lane.b32.xlu1 %v1683_v4, %s1807_s24 }
 0x198   : > { %v653_v8 = vadd.f32 %v652_v7, %v2060_v2  ;;  %v654_v9 = vpop.f32.mrb[5].mxu0  ;;  %v1425_v10 = vpack.c.bf16 %v800_v5, %v796_v60 }
 0x199   : > { %v655_v12 = vadd.f32 %v654_v9, %v2060_v2  ;;  %v1693_v13 = vpack.i.bf16 %v801_v6, %v800_v5 }
 0x19a   : > { %v804_v14 = vmax.f32 %v653_v8, 0.0 }
 0x19b   : > { %v805_v15 = vmax.f32 %v655_v12, 0.0  ;;  %v658_v16 = vpop.f32.mrb[6].mxu0  ;;  %1694 = vrot.lane.b32.xlu0 %v1693_v13, %s1807_s24  ;;  %1689 = vrot.lane.b32.xlu1 %v1683_v4, %s1808_s25 }
 0x19c   : > { %v659_v17 = vadd.f32 %v658_v16, %v2065_v11  ;;  %v660_v18 = vpop.f32.mrb[7].mxu0 }
 0x19d   : > { %v1703_v19 = vpack.i.bf16 %v805_v15, %v804_v14  ;;  %v661_v20 = vadd.f32 %v660_v18, %v2065_v11 }
 0x19e   : > { %v808_v21 = vmax.f32 %v659_v17, 0.0 }
 0x19f   : > { %v809_v22 = vmax.f32 %v661_v20, 0.0  ;;  %v664_v23 = vpop.f32.mrb[8].mxu0  ;;  %1699 = vrot.lane.b32.xlu0 %v1693_v13, %s1808_s25  ;;  %1704 = vrot.lane.b32.xlu1 %v1703_v19, %s1808_s25 }
 0x1a0   : > { %v2074_v24 = vpack.c.bf16 %v808_v21, %v804_v14  ;;  %v665_v25 = vadd.f32 %v664_v23, %v2053_v56  ;;  %v666_v26 = vpop.f32.mrb[9].mxu0 }
 0x1a1   : > { %v1708_v27 = vpack.i.bf16 %v809_v22, %v808_v21  ;;  %v667_v28 = vadd.f32 %v666_v26, %v2053_v56 }
 0x1a2   : > { %v812_v29 = vmax.f32 %v665_v25, 0.0  ;;  %1424 = vmatprep.subr.bf16.mxu0 %v2074_v24 }
 0x1a3   : > { %v813_v30 = vmax.f32 %v667_v28, 0.0  ;;  %v670_v31 = vpop.f32.mrb[10].mxu0  ;;  %1709 = vrot.lane.b32.xlu0 %v1708_v27, %s1808_s25  ;;  %1426 = vmatpush1.bf16.msra.mxu0 %v1425_v10 }
 0x1a4   : > { %v671_v32 = vadd.f32 %v670_v31, %v2057_v61  ;;  %v672_v33 = vpop.f32.mrb[11].mxu0 }
 0x1a5   : > { %v1713_v34 = vpack.i.bf16 %v813_v30, %v812_v29  ;;  %v673_v35 = vadd.f32 %v672_v33, %v2057_v61 }
 0x1a6   : > { %v816_v36 = vmax.f32 %v671_v32, 0.0 }
 0x1a7   : > { %v817_v37 = vmax.f32 %v673_v35, 0.0  ;;  %v676_v38 = vpop.f32.mrb[12].mxu0  ;;  %1714 = vrot.lane.b32.xlu1 %v1713_v34, %s1807_s24  ;;  %v751_v39 = vpop.f32.mrb[0].mxu1 }
 0x1a8   : > { %v2083_v40 = vpack.c.bf16 %v816_v36, %v812_v29  ;;  %v752_v41 = vadd.f32 %v751_v39, %v2051_v54  ;;  %v753_v42 = vpop.f32.mrb[1].mxu1  ;;  %v678_v44 = vpop.f32.mrb[13].mxu0  ;;  %v677_v49 = vadd.f32 %v676_v38, %v2086_v45 }
 0x1a9   : > { %v1723_v46 = vpack.i.bf16 %v817_v37, %v816_v36  ;;  %v754_v47 = vadd.f32 %v753_v42, %v2051_v54 }
 0x1aa   : > { %v798_v50 = vmax.f32 %v752_v41, 0.0  ;;  %v820_v63 = vmax.f32 %v677_v49, 0.0 }
 0x1ab   : > { %v799_v51 = vmax.f32 %v754_v47, 0.0  ;;  %v681_v52 = vpop.f32.mrb[14].mxu0  ;;  %1724 = vrot.lane.b32.xlu0 %v1723_v46, %s1807_s24  ;;  %1719 = vrot.lane.b32.xlu1 %v1683_v4, %s1809_s26  ;;  %v757_v55 = vpop.f32.mrb[2].mxu1 }
 0x1ac   : > { %v682_v57 = vadd.f32 %v681_v52, %v2089_v48  ;;  %v758_v58 = vadd.f32 %v757_v55, %v2049_v53  ;;  %v759_v59 = vpop.f32.mrb[3].mxu1  ;;  %v683_v60 = vpop.f32.mrb[15].mxu0 }
 0x1ad   : > { %v760_v54 = vadd.f32 %v759_v59, %v2049_v53  ;;  %v1733_v62 = vpack.i.bf16 %v799_v51, %v798_v50 }
 0x1ae   : > { %v822_v0 = vmax.f32 %v682_v57, 0.0  ;;  %v802_v1 = vmax.f32 %v758_v58, 0.0 }
 0x1af   : > { %v803_v3 = vmax.f32 %v760_v54, 0.0  ;;  %1729 = vrot.lane.b32.xlu0 %v1693_v13, %s1809_s26  ;;  %v763_v5 = vpop.f32.mrb[4].mxu1  ;;  %1734 = vrot.lane.b32.xlu1 %v1733_v62, %s1807_s24 }
 0x1b0   : > { %v2099_v4 = vpack.c.bf16 %v822_v0, %v820_v63  ;;  %v764_v6 = vadd.f32 %v763_v5, %v2060_v2  ;;  %v765_v7 = vpop.f32.mrb[5].mxu1  ;;  %v2102_v8 = vpack.c.bf16 %v802_v1, %v798_v50 }
 0x1b1   : > { %v766_v9 = vadd.f32 %v765_v7, %v2060_v2  ;;  %v1738_v53 = vpack.i.bf16 %v803_v3, %v802_v1 }
 0x1b2   : > { %v806_v10 = vmax.f32 %v764_v6, 0.0  ;;  %1440 = vmatprep.subr.bf16.mxu1 %v2099_v4 }
 0x1b3   : > { %v807_v12 = vmax.f32 %v766_v9, 0.0  ;;  %1442 = vmatpush1.bf16.msra.mxu1 %v2083_v40  ;;  %v769_v13 = vpop.f32.mrb[6].mxu1  ;;  %1739 = vrot.lane.b32.xlu0 %v1738_v53, %s1807_s24 }
 0x1b4   : > { %v770_v14 = vadd.f32 %v769_v13, %v2065_v11  ;;  %v771_v15 = vpop.f32.mrb[7].mxu1 }
 0x1b5   : > { %v1748_v16 = vpack.i.bf16 %v807_v12, %v806_v10  ;;  %v772_v17 = vadd.f32 %v771_v15, %v2065_v11 }
 0x1b6   : > { %v810_v18 = vmax.f32 %v770_v14, 0.0 }
 0x1b7   : > { %v811_v19 = vmax.f32 %v772_v17, 0.0  ;;  %v775_v20 = vpop.f32.mrb[8].mxu1 }
 0x1b8   : > { %v2110_v2 = vpack.c.bf16 %v810_v18, %v806_v10  ;;  %v776_v21 = vadd.f32 %v775_v20, %v2053_v56  ;;  %v777_v22 = vpop.f32.mrb[9].mxu1 }
 0x1b9   : > { %v1753_v23 = vpack.i.bf16 %v811_v19, %v810_v18  ;;  %v778_v25 = vadd.f32 %v777_v22, %v2053_v56 }
 0x1ba   : > { %v814_v26 = vmax.f32 %v776_v21, 0.0 }
 0x1bb   : > { %v815_v27 = vmax.f32 %v778_v25, 0.0  ;;  %v781_v28 = vpop.f32.mrb[10].mxu1  ;;  %1754 = vrot.lane.b32.xlu0 %v1753_v23, %s1808_s25 }
 0x1bc   : > { %v782_v29 = vadd.f32 %v781_v28, %v2057_v61  ;;  %v783_v30 = vpop.f32.mrb[11].mxu1 }
 0x1bd   : > { %v1743_v11 = vpack.i.bf16 %v815_v27, %v814_v26  ;;  %v784_v31 = vadd.f32 %v783_v30, %v2057_v61 }
 0x1be   : > { %v818_v32 = vmax.f32 %v782_v29, 0.0 }
 0x1bf   : > { %v819_v33 = vmax.f32 %v784_v31, 0.0  ;;  %v787_v34 = vpop.f32.mrb[12].mxu1  ;;  %1744 = vrot.lane.b32.xlu1 %v1743_v11, %s1807_s24  ;;  %v2149_v11 = vld [vmem:[%s2192_s3] sm:$0x7] }
 0x1c0   : > { %v2118_v35 = vpack.c.bf16 %v818_v32, %v814_v26  ;;  %v789_v36 = vpop.f32.mrb[13].mxu1  ;;  %v788_v37 = vadd.f32 %v787_v34, %v2086_v45  ;;  %v266_v45 = vld [vmem:[%s2193_s4] sm:$0x7] }
 0x1c1   : > { %v1763_v56 = vpack.i.bf16 %v819_v33, %v818_v32 }
 0x1c2   : > { %v821_v61 = vmax.f32 %v788_v37, 0.0 }
 0x1c3   : > { %v792_v38 = vpop.f32.mrb[14].mxu1  ;;  %1764 = vrot.lane.b32.xlu0 %v1763_v56, %s1807_s24  ;;  %1749 = vrot.lane.b32.xlu1 %v1748_v16, %s1808_s25 }
 0x1c4   : > { %v793_v39 = vadd.f32 %v792_v38, %v2089_v48  ;;  %v794_v41 = vpop.f32.mrb[15].mxu1 }
 0x1c6   : > { %v823_v42 = vmax.f32 %v793_v39, 0.0 }
 0x1c7   : > { %1769 = vrot.lane.b32.xlu0 %v1738_v53, %s1808_s25  ;;  %1759 = vrot.lane.b32.xlu1 %v1733_v62, %s1808_s25 }
 0x1c8   : > { %v2126_v44 = vpack.c.bf16 %v823_v42, %v821_v61 }
 0x1cb   : > { %1779 = vrot.lane.b32.xlu0 %v1738_v53, %s1809_s26  ;;  %1774 = vrot.lane.b32.xlu1 %v1733_v62, %s1809_s26  ;;  %s1358_s26 = sshll.u32 %s2196_s19, 5 }
 0x1cc   : > { %s224_s20 = scalar_lea.vmem %s2194_s5, %s1358_s26 }
 0x1cf   : > { %970 = vperm.xlu1 %1682, %v266_v45  }
 0x209   : > { %v1685_v46 = vpop.permute.xlu1 %1684 }
 0x20a   : > { %v1687_v47 = vunpack.i.h.bf16 %v1685_v46  ;;  %v1686_v48 = vunpack.i.l.bf16 %v1685_v46 }
 0x20c   : > { %v836_v55 = vsel %vm303_vm0, %v1686_v48, %v1687_v47 }
 0x20d   : > { %v1695_v49 = vpop.permute.xlu0 %1694  ;;  %v1690_v50 = vpop.permute.xlu1 %1689 }
 0x20e   : > { %v1697_v51 = vunpack.i.h.bf16 %v1695_v49  ;;  %v1696_v52 = vunpack.i.l.bf16 %v1695_v49  ;;  %v1692_v12 = vunpack.i.h.bf16 %v1690_v50  ;;  %v1691_v13 = vunpack.i.l.bf16 %v1690_v50 }
 0x210   : > { %v837_v57 = vsel %vm303_vm0, %v1696_v52, %v1697_v51  ;;  %v864_v26 = vsel %vm396_vm1, %v1691_v13, %v1692_v12 }
 0x211   : > { %v1427_v58 = vpack.c.bf16 %v837_v57, %v836_v55  ;;  %v1700_v59 = vpop.permute.xlu0 %1699  ;;  %v1705_v60 = vpop.permute.xlu1 %1704 }
 0x212   : > { %v1707_v63 = vunpack.i.h.bf16 %v1705_v60  ;;  %v1706_v0 = vunpack.i.l.bf16 %v1705_v60  ;;  %v1702_v14 = vunpack.i.h.bf16 %v1700_v59 }
 0x213   : > { %1428 = vmatprep.subr.bf16.mxu0 %v1427_v58 }
 0x214   : > { %1430 = vmatpush1.bf16.msra.mxu0 %v2074_v24  ;;  %v1701_v24 = vunpack.i.l.bf16 %v1700_v59 }
 0x215   : > { %1432 = vmatprep.subr.bf16.mxu0 %v2099_v4  ;;  %v1710_v54 = vpop.permute.xlu0 %1709 }
 0x216   : > { %v1712_v1 = vunpack.i.h.bf16 %v1710_v54  ;;  %v1711_v3 = vunpack.i.l.bf16 %v1710_v54  ;;  %v865_v27 = vsel %vm396_vm1, %v1701_v24, %v1702_v14 }
 0x217   : > { %v1449_v33 = vpack.c.bf16 %v865_v27, %v864_v26 }
 0x218   : > { %1434 = vmatpush1.bf16.msra.mxu0 %v2083_v40  ;;  %v880_v40 = vsel %vm396_vm1, %v1706_v0, %v1707_v63  ;;  %v881_v17 = vsel %vm396_vm1, %v1711_v3, %v1712_v1 }
 0x219   : > { %v1715_v62 = vpop.permute.xlu1 %1714  ;;  %v1447_v28 = vpack.c.bf16 %v881_v17, %v880_v40 }
 0x21a   : > { %v1717_v5 = vunpack.i.h.bf16 %v1715_v62  ;;  %v1716_v6 = vunpack.i.l.bf16 %v1715_v62 }
 0x21c   : > { %v852_v15 = vsel %vm303_vm0, %v1716_v6, %v1717_v5 }
 0x21d   : > { %v1725_v7 = vpop.permute.xlu0 %1724  ;;  %v1720_v9 = vpop.permute.xlu1 %1719 }
 0x21e   : > { %v1727_v53 = vunpack.i.h.bf16 %v1725_v7  ;;  %v1726_v10 = vunpack.i.l.bf16 %v1725_v7  ;;  %v1722_v21 = vunpack.i.h.bf16 %v1720_v9  ;;  %v1721_v22 = vunpack.i.l.bf16 %v1720_v9 }
 0x220   : > { %v853_v16 = vsel %vm303_vm0, %v1726_v10, %v1727_v53  ;;  %v892_v56 = vsel %vm477_vm2, %v1721_v22, %v1722_v21 }
 0x221   : > { %v1730_v18 = vpop.permute.xlu0 %1729  ;;  %v1735_v19 = vpop.permute.xlu1 %1734  ;;  %v1435_v20 = vpack.c.bf16 %v853_v16, %v852_v15 }
 0x222   : > { %v1732_v23 = vunpack.i.h.bf16 %v1730_v18  ;;  %v1731_v25 = vunpack.i.l.bf16 %v1730_v18  ;;  %v1737_v29 = vunpack.i.h.bf16 %v1735_v19  ;;  %v1736_v30 = vunpack.i.l.bf16 %v1735_v19 }
 0x223   : > { %1436 = vmatprep.subr.bf16.mxu0 %v1435_v20  ;;  %1444 = vmatprep.subr.bf16.mxu1 %v1435_v20 }
 0x224   : > { %1438 = vmatpush1.bf16.msra.mxu0 %v2099_v4  ;;  %1446 = vmatpush1.bf16.msra.mxu1 %v2099_v4  ;;  %v893_v31 = vsel %vm477_vm2, %v1731_v25, %v1732_v23  ;;  %v908_v37 = vsel %vm303_vm0, %v1736_v30, %v1737_v29 }
 0x225   : > { %1448 = vmatprep.subr.bf16.mxu1 %v1447_v28  ;;  %1456 = vmatprep.subr.bf16.mxu0 %v2110_v2  ;;  %v1740_v32 = vpop.permute.xlu0 %1739  ;;  %v1451_v4 = vpack.c.bf16 %v893_v31, %v892_v56 }
 0x226   : > { %v1742_v34 = vunpack.i.h.bf16 %v1740_v32  ;;  %v1741_v36 = vunpack.i.l.bf16 %v1740_v32 }
 0x227   : > { %1352 = vmatmul.mubr.msk.f32.vlgmr.msra.gmra.mrb[16].mxu0 %vm973_vm3, %v2149_v11 }
 0x228   : > { %1450 = vmatpush1.bf16.msra.mxu1 %v1449_v33  ;;  %1458 = vmatpush1.bf16.msra.mxu0 %v2102_v8  ;;  %v909_v38 = vsel %vm303_vm0, %v1741_v36, %v1742_v34 }
 0x229   : > { %1452 = vmatprep.subr.bf16.mxu1 %v1451_v4  ;;  %v1459_v39 = vpack.c.bf16 %v909_v38, %v908_v37  ;;  %1183 = vmatprep.mubr.f32.mxu0 %v1810_v43 }
 0x22b   : > { %1460 = vmatprep.subr.bf16.mxu0 %v1459_v39 }
 0x22c   : > { %1454 = vmatpush1.bf16.msra.mxu1 %v1447_v28  ;;  %1462 = vmatpush1.bf16.msra.mxu0 %v2110_v2 }
 0x22d   : > { %1472 = vmatprep.subr.bf16.mxu1 %v2126_v44  ;;  %1464 = vmatprep.subr.bf16.mxu0 %v2126_v44  ;;  %v1755_v8 = vpop.permute.xlu0 %1754 }
 0x22e   : > { %v1757_v45 = vunpack.i.h.bf16 %v1755_v8  ;;  %v1756_v46 = vunpack.i.l.bf16 %v1755_v8 }
 0x22f   : > { %1353 = vmatmul.mubr.msk.f32.vlgmr.msra.gmra.mrb[16].mxu1 %vm973_vm3, %v2149_v11 }
 0x230   : > { %1474 = vmatpush1.bf16.msra.mxu1 %v2118_v35  ;;  %1466 = vmatpush1.bf16.msra.mxu0 %v2118_v35 }
 0x231   : > { %v1745_v41 = vpop.permute.xlu1 %1744  ;;  %1254 = vmatprep.mubr.f32.mxu1 %v1810_v43  ;;  %v953_v43 = vsel %vm396_vm1, %v1756_v46, %v1757_v45 }
 0x232   : > { %v1747_v61 = vunpack.i.h.bf16 %v1745_v41  ;;  %v1746_v42 = vunpack.i.l.bf16 %v1745_v41 }
 0x234   : > { %v924_v52 = vsel %vm303_vm0, %v1746_v42, %v1747_v61 }
 0x235   : > { %v1765_v2 = vpop.permute.xlu0 %1764  ;;  %v1750_v47 = vpop.permute.xlu1 %1749 }
 0x236   : > { %v1767_v48 = vunpack.i.h.bf16 %v1765_v2  ;;  %v1766_v49 = vunpack.i.l.bf16 %v1765_v2  ;;  %v1752_v50 = vunpack.i.h.bf16 %v1750_v47  ;;  %v1751_v51 = vunpack.i.l.bf16 %v1750_v47 }
 0x238   : > { %v925_v55 = vsel %vm303_vm0, %v1766_v49, %v1767_v48  ;;  %v952_v35 = vsel %vm396_vm1, %v1751_v51, %v1752_v50 }
 0x239   : > { %v1770_v57 = vpop.permute.xlu0 %1769  ;;  %v1760_v58 = vpop.permute.xlu1 %1759  ;;  %v1467_v59 = vpack.c.bf16 %v925_v55, %v924_v52  ;;  %v1479_v0 = vpack.c.bf16 %v953_v43, %v952_v35 }
 0x23a   : > { %v1772_v60 = vunpack.i.h.bf16 %v1770_v57  ;;  %v1771_v54 = vunpack.i.l.bf16 %v1770_v57  ;;  %v1762_v62 = vunpack.i.h.bf16 %v1760_v58  ;;  %v1761_v63 = vunpack.i.l.bf16 %v1760_v58 }
 0x23b   : > { %1468 = vmatprep.subr.bf16.mxu0 %v1467_v59  ;;  %1476 = vmatprep.subr.bf16.mxu1 %v1467_v59 }
 0x23c   : > { %v937_v1 = vsel %vm396_vm1, %v1771_v54, %v1772_v60  ;;  %v936_v3 = vsel %vm396_vm1, %v1761_v63, %v1762_v62  ;;  %1470 = vmatpush1.bf16.msra.mxu0 %v2126_v44  ;;  %1478 = vmatpush1.bf16.msra.mxu1 %v2126_v44 }
 0x23d   : > { %v1481_v5 = vpack.c.bf16 %v937_v1, %v936_v3  ;;  %v1780_v6 = vpop.permute.xlu0 %1779  ;;  %v1775_v7 = vpop.permute.xlu1 %1774  ;;  %1480 = vmatprep.subr.bf16.mxu1 %v1479_v0 }
 0x23e   : > { %v1782_v9 = vunpack.i.h.bf16 %v1780_v6  ;;  %v1781_v53 = vunpack.i.l.bf16 %v1780_v6  ;;  %v1777_v10 = vunpack.i.h.bf16 %v1775_v7  ;;  %v1776_v12 = vunpack.i.l.bf16 %v1775_v7 }
 0x23f   : > { %1354 = vmatmul.mubr.msk.f32.vlgmr.msra.gmra.mrb[18].mxu0 %vm973_vm3, %v2149_v11 }
 0x240   : > { %1482 = vmatpush1.bf16.msra.mxu1 %v1481_v5  ;;  %v964_v13 = vsel %vm477_vm2, %v1776_v12, %v1777_v10  ;;  %v965_v14 = vsel %vm477_vm2, %v1781_v53, %v1782_v9 }
 0x241   : > { %v1483_v24 = vpack.c.bf16 %v965_v14, %v964_v13 }
 0x243   : > { %1484 = vmatprep.subr.bf16.mxu1 %v1483_v24 }
 0x244   : > { %1486 = vmatpush1.bf16.msra.mxu1 %v1479_v0 }
 0x247   : > { %1355 = vmatmul.mubr.msk.f32.vlgmr.msra.gmra.mrb[18].mxu1 %vm973_vm3, %v2149_v11 }
 0x24e   : > { %v971_v44 = vpop.permute.xlu1 %970 }
 0x2fa   : > { %v1043_v15 = vpop.f32.mrb[16].mxu0 }
 0x2fb   : > { %v1044_v16 = vadd.f32 %v1043_v15, %v971_v44  ;;  %v1045_v40 = vpop.f32.mrb[17].mxu0 }
 0x2fc   : > { %v1046_v17 = vadd.f32 %v1045_v40, %v971_v44 }
 0x2fd   : > { %1783 = vtanh.f32 %v1044_v16 }
 0x2fe   : > { %1785 = vtanh.f32 %v1046_v17 }
 0x302   : > { %v1114_v18 = vpop.f32.mrb[16].mxu1 }
 0x303   : > { %v1115_v19 = vadd.f32 %v1114_v18, %v971_v44  ;;  %v1116_v20 = vpop.f32.mrb[17].mxu1 }
 0x304   : > { %v1117_v21 = vadd.f32 %v1116_v20, %v971_v44 }
 0x305   : > { %1787 = vtanh.f32 %v1115_v19 }
 0x306   : > { %1789 = vtanh.f32 %v1117_v21 }
 0x307   : > { %v1784_v22 = vpop.eup %1783 }
 0x308   : > { %v1786_v23 = vpop.eup %1785 }
 0x309   : > { %v1277_v25 = vcombine.low %v1784_v22, %v1786_v23 }
 0x30b   : > { %1285 = vst [vmem:[%s224_s20] sm:$0x77] %v1277_v25 }
 0x30f   : > { %v1788_v26 = vpop.eup %1787 }
 0x310   : > { %v1790_v27 = vpop.eup %1789 }
 0x311   : > { %v1278_v28 = vcombine.low %v1788_v26, %v1790_v27 }
 0x312   : > { %v1185_v29 = vpop.f32.mrb[18].mxu0 }
 0x313   : > { %1286 = vst [vmem:[%s224_s20 + $0x8] sm:$0x77] %v1278_v28  ;;  %v1186_v30 = vadd.f32 %v1185_v29, %v971_v44  ;;  %v1187_v11 = vpop.f32.mrb[19].mxu0 }
 0x314   : > { %v1188_v31 = vadd.f32 %v1187_v11, %v971_v44 }
 0x315   : > { %1791 = vtanh.f32 %v1186_v30 }
 0x316   : > { %1793 = vtanh.f32 %v1188_v31 }
 0x31a   : > { %v1256_v32 = vpop.f32.mrb[18].mxu1 }
 0x31b   : > { %v1257_v33 = vadd.f32 %v1256_v32, %v971_v44  ;;  %v1258_v34 = vpop.f32.mrb[19].mxu1 }
 0x31c   : > { %v1259_v36 = vadd.f32 %v1258_v34, %v971_v44 }
 0x31d   : > { %1795 = vtanh.f32 %v1257_v33 }
 0x31e   : > { %1797 = vtanh.f32 %v1259_v36 }
 0x31f   : > { %v1792_v56 = vpop.eup %1791 }
 0x320   : > { %v1794_v4 = vpop.eup %1793 }
 0x321   : > { %v1279_v37 = vcombine.low %v1792_v56, %v1794_v4 }
 0x323   : > { %1287 = vst [vmem:[%s224_s20 + $0x10] sm:$0x77] %v1279_v37 }
 0x327   : > { %v1796_v38 = vpop.eup %1795 }
 0x328   : > { %v1798_v39 = vpop.eup %1797 }
 0x329   : > { %v1280_v8 = vcombine.low %v1796_v38, %v1798_v39 }
 0x32b   : > { %1288 = vst [vmem:[%s224_s20 + $0x18] sm:$0x77] %v1280_v8 }
 0x32c PF: > { %s15_s18 = sadd.s32 1, %s1805_s18  }
 0x32d   : > { %p12_p4 = scmp.ge.s32.totalorder %s15_s18, 4  }
 0x32f   :  { %14 = sbr.rel (!%p12_p4) target bundleno = 1 (0x1), region = 70 }

</bundles_post_ra>
